<compile_context>
chip_gen: v6e
topology: v6e:2x2x1
jax: 0.10.0
libtpu: 0.0.40
codegen_flags: <defaults>
</compile_context>

<pallas_src>
import math

import jax
import jax.numpy as jnp
from jax.experimental import pallas as pl
from jax.experimental.pallas import tpu as pltpu


_VMEM_LIMIT_BYTES = 48 * 1024 * 1024   # safe on v7x (64 MiB phys); > default scoped limits on v5e/v6e
_VMEM_BUDGET_BYTES = 40 * 1024 * 1024  # what we plan tile sizes against (leave headroom)


def _round_up(x, m):
    return (x + m - 1) // m * m


def _linear_kernel(x_ref, wt_ref, b_ref, o_ref):
    # x_ref : (tm, K)   batch tile (pipelined), compute dtype (bf16)
    # wt_ref: (K, Np)   resident pre-transposed weight, compute dtype (bf16)
    # b_ref : (1, Np)   resident f32 bias row
    # o_ref : (tm, Np)  lane-dense output tile
    z = jnp.dot(x_ref[...], wt_ref[...], preferred_element_type=jnp.float32)
    o_ref[...] = (z + b_ref[...]).astype(o_ref.dtype)


def prepare_linear_params(weight, bias, compute_dtype=jnp.bfloat16):
    """One-time parameter prep (hoist out of the per-call path).

    Pads the class axis to a lane-dense multiple of 128, pre-transposes the
    weight to [in_ftrs, out_pad] in the matmul dtype, keeps the bias in f32.
    """
    N, K = weight.shape
    Np = _round_up(N, 128)
    w_pad = jnp.pad(weight, ((0, Np - N), (0, 0))) if Np != N else weight
    wt = w_pad.T.astype(compute_dtype)                                   # (K, Np)
    b2 = jnp.pad(bias, (0, Np - N)).reshape(1, Np).astype(jnp.float32)   # (1, Np)
    return wt, b2


def _choose_tm(B, K, Np, x_itemsize, w_itemsize, o_itemsize, tm_max):
    if B <= 8:
        return B  # single tile; block == full batch dim is always legal
    resident = K * Np * w_itemsize + Np * 4            # single-buffered weight + f32 bias
    per_row = 2 * (K * x_itemsize + Np * o_itemsize)   # double-buffered x / out tiles
    avail = max(_VMEM_BUDGET_BYTES - resident, 8 * per_row)
    tm_cap = max(8, (avail // per_row) // 8 * 8)
    tm = _round_up(pl.cdiv(B, 2), 8)  # >= 2 grid steps when possible (v7x megacore)
    return max(8, min(tm, tm_max, tm_cap))


def linear_classifier_forward(x, wt, b2, n_classes, *, compute_dtype=jnp.bfloat16,
                              tm_max=512):
    """z = x @ weight.T + bias, using pre-prepared (wt, b2) from prepare_linear_params."""
    orig_shape = x.shape
    if x.ndim > 2:  # nn.Linear accepts (..., in_ftrs)
        x = x.reshape(-1, orig_shape[-1])
    B, K = x.shape
    Kw, Np = wt.shape
    assert K == Kw and Np % 128 == 0 and n_classes <= Np

    out_dtype = x.dtype
    x_c = x.astype(compute_dtype)

    x_isz = jnp.dtype(compute_dtype).itemsize
    o_isz = jnp.dtype(out_dtype).itemsize
    tm = _choose_tm(B, K, Np, x_isz, wt.dtype.itemsize, o_isz, tm_max)
    nb = pl.cdiv(B, tm)

    cost = pl.CostEstimate(
        flops=2 * B * K * Np,
        transcendentals=0,
        bytes_accessed=(B * K * x_isz + K * Np * wt.dtype.itemsize
                        + Np * 4 + B * Np * o_isz),
    )

    def _call(single_buffer_resident):
        resident_kw = ({"pipeline_mode": pl.Buffered(1)}
                       if single_buffer_resident else {})
        return pl.pallas_call(
            _linear_kernel,
            out_shape=jax.ShapeDtypeStruct((B, Np), out_dtype),
            grid_spec=pltpu.PrefetchScalarGridSpec(
                num_scalar_prefetch=0,
                grid=(nb,),
                in_specs=[
                    # x: tiled along batch (ragged last tile allowed), full K.
                    pl.BlockSpec((tm, K), lambda i: (i, 0)),
                    # weight / bias: constant block index -> DMA'd once, resident.
                    pl.BlockSpec((K, Np), lambda i: (0, 0), **resident_kw),
                    pl.BlockSpec((1, Np), lambda i: (0, 0), **resident_kw),
                ],
                out_specs=pl.BlockSpec((tm, Np), lambda i: (i, 0)),
            ),
            compiler_params=pltpu.CompilerParams(
                dimension_semantics=("parallel",),
                vmem_limit_bytes=_VMEM_LIMIT_BYTES,
            ),
            cost_estimate=cost,
        )(x_c, wt, b2)

    try:
        out = _call(True)
    except Exception:
        # Fallback for jax versions where Buffered(1) on a pallas_call BlockSpec
        # is not supported; correctness is unaffected.
        out = _call(False)

    z = out[:, :n_classes]  # strip lane padding of the class axis
    if len(orig_shape) > 2:
        z = z.reshape(*orig_shape[:-1], n_classes)
    return z


def linear_classifier(x, weight, bias, *, compute_dtype=jnp.bfloat16, tm_max=512):
    """Convenience one-shot path: z = x @ weight.T + bias."""
    wt, b2 = prepare_linear_params(weight, bias, compute_dtype)
    return linear_classifier_forward(x, wt, b2, weight.shape[0],
                                     compute_dtype=compute_dtype, tm_max=tm_max)


if __name__ == "__main__":
    # Small shapes consistent with the module: batch=8, in_ftrs=32, out_ftrs=10
    B, in_ftrs, out_ftrs = 8, 32, 10

    key = jax.random.PRNGKey(0)
    kx, kw, kb = jax.random.split(key, 3)

    # Deterministic init mirroring nn.Linear default: U(-1/sqrt(in), 1/sqrt(in))
    bound = 1.0 / math.sqrt(in_ftrs)
    x = jax.random.normal(kx, (B, in_ftrs), dtype=jnp.float32)
    weight = jax.random.uniform(
        kw, (out_ftrs, in_ftrs), minval=-bound, maxval=bound, dtype=jnp.float32
    )
    bias = jax.random.uniform(
        kb, (out_ftrs,), minval=-bound, maxval=bound, dtype=jnp.float32
    )

    # One-time param prep (hoisted), then forward.
    wt, b2 = prepare_linear_params(weight, bias, compute_dtype=jnp.bfloat16)
    z = linear_classifier_forward(x, wt, b2, out_ftrs, compute_dtype=jnp.bfloat16)
    z = jax.block_until_ready(z)

    assert z.shape == (B, out_ftrs)

    # Reference with matching bf16 operands / f32 accumulation (tight check).
    z_ref_bf16 = (
        jnp.dot(x.astype(jnp.bfloat16), weight.astype(jnp.bfloat16).T,
                preferred_element_type=jnp.float32) + bias
    ).astype(x.dtype)
    assert jnp.allclose(z, z_ref_bf16, atol=1e-3, rtol=1e-3)

    # Full-f32 torch.nn.Linear reference (loose sanity check on bf16 compute).
    z_ref_f32 = x @ weight.T + bias
    assert jnp.allclose(z, z_ref_f32, atol=5e-2, rtol=5e-2)

    print("KERNEL_OK")
</pallas_src>

<mosaic_0001>
module attributes {stable_mosaic.version = 11 : i64} {
  func.func @_linear_kernel(%arg0: i32, %arg1: memref<8x32xbf16, #tpu.memory_space<vmem>>, %arg2: memref<32x128xbf16, #tpu.memory_space<vmem>>, %arg3: memref<1x128xf32, #tpu.memory_space<vmem>>, %arg4: memref<8x128xf32, #tpu.memory_space<vmem>>) attributes {dimension_semantics = [#tpu.dimension_semantics<parallel>], iteration_bounds = array<i64: 1>, scalar_prefetch = 0 : i64, scratch_operands = 0 : i64, tpu.core_type = #tpu.core_type<tc>, window_params = [{transform_indices = @transform_0, window_bounds = array<i64: 8, 32>}, {pipeline_mode = #tpu.pipeline_mode<synchronous>, transform_indices = @transform_1, window_bounds = array<i64: 32, 128>}, {pipeline_mode = #tpu.pipeline_mode<synchronous>, transform_indices = @transform_2, window_bounds = array<i64: 1, 128>}, {transform_indices = @transform_3, window_bounds = array<i64: 8, 128>}]} {
    %c0 = arith.constant 0 : index
    %c0_0 = arith.constant 0 : index
    %0 = vector.load %arg1[%c0, %c0_0] : memref<8x32xbf16, #tpu.memory_space<vmem>>, vector<8x32xbf16>
    %c0_1 = arith.constant 0 : index
    %c0_2 = arith.constant 0 : index
    %1 = vector.load %arg2[%c0_1, %c0_2] : memref<32x128xbf16, #tpu.memory_space<vmem>>, vector<32x128xbf16>
    %cst = arith.constant dense<0.000000e+00> : vector<8x128xf32>
    %2 = tpu.matmul %0, %1, %cst {dimension_numbers = #tpu.dot_dimension_numbers<[1], [0], [0], [1], [0, 0, 1, 1], [], []>} : vector<8x32xbf16>, vector<32x128xbf16>, vector<8x128xf32> -> vector<8x128xf32>
    %c0_3 = arith.constant 0 : index
    %c0_4 = arith.constant 0 : index
    %3 = vector.load %arg3[%c0_3, %c0_4] : memref<1x128xf32, #tpu.memory_space<vmem>>, vector<1x128xf32>
    %4 = vector.broadcast %3 : vector<1x128xf32> to vector<8x128xf32>
    %5 = arith.addf %2, %4 : vector<8x128xf32>
    %c0_5 = arith.constant 0 : index
    %c0_6 = arith.constant 0 : index
    %6 = vector.load %arg4[%c0_5, %c0_6] : memref<8x128xf32, #tpu.memory_space<vmem>>, vector<8x128xf32>
    tpu.vector_store %arg4[%c0_5, %c0_6], %5 {strides = array<i32>} : memref<8x128xf32, #tpu.memory_space<vmem>>, vector<8x128xf32>,
    return
  }
  func.func @transform_0(%arg0: i32) -> (i32, i32) {
    %c0_i32 = arith.constant 0 : i32
    %c0_i32_0 = arith.constant 0 : i32
    return %arg0, %c0_i32 : i32, i32
  }
  func.func @transform_1(%arg0: i32) -> (i32, i32) {
    %c0_i32 = arith.constant 0 : i32
    %c0_i32_0 = arith.constant 0 : i32
    %c0_i32_1 = arith.constant 0 : i32
    return %c0_i32, %c0_i32_0 : i32, i32
  }
  func.func @transform_2(%arg0: i32) -> (i32, i32) {
    %c0_i32 = arith.constant 0 : i32
    %c0_i32_0 = arith.constant 0 : i32
    %c0_i32_1 = arith.constant 0 : i32
    return %c0_i32, %c0_i32_0 : i32, i32
  }
  func.func @transform_3(%arg0: i32) -> (i32, i32) {
    %c0_i32 = arith.constant 0 : i32
    %c0_i32_0 = arith.constant 0 : i32
    return %arg0, %c0_i32 : i32, i32
  }
}

module attributes {stable_mosaic.version = 11 : i64} {
  func.func @_linear_kernel(%arg0: i32, %arg1: memref<8x32xbf16, #tpu.memory_space<vmem>>, %arg2: memref<32x128xbf16, #tpu.memory_space<vmem>>, %arg3: memref<1x128xf32, #tpu.memory_space<vmem>>, %arg4: memref<8x128xf32, #tpu.memory_space<vmem>>) attributes {dimension_semantics = [#tpu.dimension_semantics<parallel>], iteration_bounds = array<i64: 1>, scalar_prefetch = 0 : i64, scratch_operands = 0 : i64, tpu.core_type = #tpu.core_type<tc>, window_params = [{transform_indices = @transform_0, window_bounds = array<i64: 8, 32>}, {pipeline_mode = #tpu.pipeline_mode<synchronous>, transform_indices = @transform_1, window_bounds = array<i64: 32, 128>}, {pipeline_mode = #tpu.pipeline_mode<synchronous>, transform_indices = @transform_2, window_bounds = array<i64: 1, 128>}, {transform_indices = @transform_3, window_bounds = array<i64: 8, 128>}]} {
    %c0 = arith.constant 0 : index
    %c0_0 = arith.constant 0 : index
    %0 = vector.load %arg1[%c0, %c0_0] : memref<8x32xbf16, #tpu.memory_space<vmem>>, vector<8x32xbf16>
    %c0_1 = arith.constant 0 : index
    %c0_2 = arith.constant 0 : index
    %1 = vector.load %arg2[%c0_1, %c0_2] : memref<32x128xbf16, #tpu.memory_space<vmem>>, vector<32x128xbf16>
    %cst = arith.constant dense<0.000000e+00> : vector<8x128xf32>
    %2 = tpu.matmul %0, %1, %cst {dimension_numbers = #tpu.dot_dimension_numbers<[1], [0], [0], [1], [0, 0, 1, 1], [], []>} : vector<8x32xbf16>, vector<32x128xbf16>, vector<8x128xf32> -> vector<8x128xf32>
    %c0_3 = arith.constant 0 : index
    %c0_4 = arith.constant 0 : index
    %3 = vector.load %arg3[%c0_3, %c0_4] : memref<1x128xf32, #tpu.memory_space<vmem>>, vector<1x128xf32>
    %4 = vector.broadcast %3 : vector<1x128xf32> to vector<8x128xf32>
    %5 = arith.addf %2, %4 : vector<8x128xf32>
    %c0_5 = arith.constant 0 : index
    %c0_6 = arith.constant 0 : index
    %6 = vector.load %arg4[%c0_5, %c0_6] : memref<8x128xf32, #tpu.memory_space<vmem>>, vector<8x128xf32>
    tpu.vector_store %arg4[%c0_5, %c0_6], %5 {strides = array<i32>} : memref<8x128xf32, #tpu.memory_space<vmem>>, vector<8x128xf32>,
    return
  }
  func.func @transform_0(%arg0: i32) -> (i32, i32) {
    %c0_i32 = arith.constant 0 : i32
    %c0_i32_0 = arith.constant 0 : i32
    return %arg0, %c0_i32 : i32, i32
  }
  func.func @transform_1(%arg0: i32) -> (i32, i32) {
    %c0_i32 = arith.constant 0 : i32
    %c0_i32_0 = arith.constant 0 : i32
    %c0_i32_1 = arith.constant 0 : i32
    return %c0_i32, %c0_i32_0 : i32, i32
  }
  func.func @transform_2(%arg0: i32) -> (i32, i32) {
    %c0_i32 = arith.constant 0 : i32
    %c0_i32_0 = arith.constant 0 : i32
    %c0_i32_1 = arith.constant 0 : i32
    return %c0_i32, %c0_i32_0 : i32, i32
  }
  func.func @transform_3(%arg0: i32) -> (i32, i32) {
    %c0_i32 = arith.constant 0 : i32
    %c0_i32_0 = arith.constant 0 : i32
    return %arg0, %c0_i32 : i32, i32
  }
}

</mosaic_0001>

<bundles_post_ra>
// kernel: tpu_custom_call.1
= control target key start
LH: loop header
LB: loop body
LE: loop exit
PB: predicated region body
PF: predicated region fallthrough
CT: control target
= control target key end

     0   :  { %8 = vsyncpa [#allocation3], 0  ;;  %s256_s0 = inlined_call_operand.hbm [shape: bf16[8,32], index: 0, kind: input, shape index: {}]   ;;  %s257_s1 = inlined_call_operand.hbm [shape: bf16[32,128], index: 1, kind: input, shape index: {}]   ;;  %s258_s2 = inlined_call_operand.vmem [shape: f32[1,128], index: 2, kind: input, shape index: {}]   ;;  %s259_s3 = inlined_call_operand.hbm [shape: f32[8,128], index: 3, kind: output, shape index: {}]  }
   0x1   :  { %9 = vsyncpa [#allocation6], 0 }
   0x2   :  { %10 = vsyncpa [#allocation4], 0  ;;  %s217_s12 = smov [#allocation2]   ;;  %s218_s14 = smov [#allocation5]  }
   0x3   :  { %s17_s13 = sshll.u32 %s217_s12, 4  ;;  %s26_s15 = sshll.u32 %s218_s14, 4  ;;  %s18_s13 = int_to_ptr.vmem [resolvable:$true] %s17_s13  ;;  %s27_s15 = int_to_ptr.vmem [resolvable:$true] %s26_s15 }
   0x4   :  { %s159_s16 = scalar_lea.vmem %s18_s13, 64  ;;  %p164_p1 = scmp.lt.s32.totalorder %s18_s13, %s18_s13 }
   0x5   :  { %p160_p0 = scmp.ne.s32.totalorder %s18_s13, %s159_s16  ;;  %p165_p2 = scmp.lt.s32.totalorder %s159_s16, %s159_s16 }
   0x7   :  { %p166_p3 = por %p165_p2, %p164_p1 }
   0x9   :  { %p167_p4 = pnand %p166_p3, %p160_p0 }
   0xb   :  { %170 = shalt.err (!%p167_p4)
}
   0xc   :  { %20 = dma.hbm_to_vmem [thread:$0]  %s256_s0, 64, %s18_s13, [#allocation3]  }
   0xd   :  { %s179_s19 = scalar_lea.vmem %s27_s15, 256  ;;  %p184_p6 = scmp.lt.s32.totalorder %s27_s15, %s27_s15 }
   0xe   :  { %p180_p5 = scmp.ne.s32.totalorder %s27_s15, %s179_s19  ;;  %p185_p7 = scmp.lt.s32.totalorder %s179_s19, %s179_s19 }
  0x10   :  { %p186_p8 = por %p185_p7, %p184_p6 }
  0x12   :  { %p187_p9 = pnand %p186_p8, %p180_p5 }
  0x14   :  { %190 = shalt.err (!%p187_p9)
}
  0x15   :  { %s219_s20 = smov 64   ;;  %s220_s21 = smov 4  }
  0x16   :  { %32 = dma.hbm_to_vmem [thread:$0]  %s257_s1, 256, %s27_s15, [#allocation6], %s219_s20, %s219_s20, %s220_s21  }
  0x17   :  { %211 = dma.done.wait [#allocation3], 64  }
  0x18   :  { %212 = vsyncadd [#allocation3], 4294967232 }
  0x19   :  { %213 = dma.done.wait [#allocation6], 256  }
  0x1a   :  { %214 = vsyncadd [#allocation6], 4294967040  ;;  %v221_v0 = vmov 0.0   ;;  %vm222_vm0 = vmmov 0   ;;  %v149_v1 = vld [vmem:[#allocation5 + $0x8] sm:$0xff]   ;;  %v150_v2 = vld [vmem:[#allocation5] sm:$0xff]  }
  0x1b   :  { %134 = vmatprep.subr.bf16.mxu0 %v221_v0  ;;  %138 = vmatprep.mubr.msk.bf16.mxu0 %vm222_vm0, %v221_v0  ;;  %v42_v3 = vld [vmem:[#allocation2] sm:$0xf]  ;;  %vm66_vm1 = vcmask 261120   ;;  %s223_s1 = smov [#allocation7]  }
  0x1c   :  { %135 = vmatpush3.bf16.msra.mxu0 %v149_v1  ;;  %v127_v4 = vld [vmem:[%s258_s2] ss:$0 sm:$0xff]  ;;  %s117_s25 = sshll.u32 %s223_s1, 4  ;;  %s118_s25 = int_to_ptr.vmem [resolvable:$true] %s117_s25 }
  0x1d   :  { %136 = vmatprep.subr.bf16.mxu0 %v221_v0  ;;  %s191_s26 = scalar_lea.vmem %s118_s25, 128  ;;  %p196_p11 = scmp.lt.s32.totalorder %s118_s25, %s118_s25 }
  0x1e   :  { %p192_p10 = scmp.ne.s32.totalorder %s118_s25, %s191_s26  ;;  %p197_p12 = scmp.lt.s32.totalorder %s191_s26, %s191_s26 }
  0x20   :  { %137 = vmatpush3.bf16.msra.mxu0 %v150_v2  ;;  %p198_p13 = por %p197_p12, %p196_p11 }
  0x22   :  { %p199_p0 = pnand %p198_p13, %p192_p10 }
  0x23   :  { %139 = vmatmul.mubr.msk.bf16.vlgmr.msra.gmra.mxu0 %vm66_vm1, %v42_v3 }
  0xe3   :  { %v104_v5 = vpop.f32.mrf.mxu0 }
  0xe4   :  { %v105_v6 = vadd.f32 %v127_v4, %v104_v5 }
  0xe5   :  { %v140_v7 = vpop.f32.mrf.mxu0 }
  0xe6   :  { %110 = vst [vmem:[#allocation7] sm:$0xff] %v105_v6 }
  0xe7   :  { %v107_v8 = vpop.f32.mrf.mxu0 }
  0xe8   :  { %202 = shalt.err (!%p199_p0)
}
  0xe9   :  { %120 = dma.vmem_to_hbm [thread:$0]  %s118_s25, 128, %s259_s3, [#allocation4]   ;;  %v141_v9 = vpop.f32.mrf.mxu0 }
  0xea   :  { %215 = dma.done.wait [#allocation4], 128  }
  0xeb   :  { %216 = vsyncadd [#allocation4], 4294967168 }
  0xec   :  { %124 = vsyncpa [#allocation3], 1 }
  0xed   :  { %125 = vsyncpa [#allocation6], 1 }
  0xee   :  { %126 = vsyncpa [#allocation4], 1 }

// kernel: tpu_custom_call.1
= control target key start
LH: loop header
LB: loop body
LE: loop exit
PB: predicated region body
PF: predicated region fallthrough
CT: control target
= control target key end

     0   :  { %8 = vsyncpa [#allocation3], 0  ;;  %s256_s0 = inlined_call_operand.hbm [shape: bf16[8,32], index: 0, kind: input, shape index: {}]   ;;  %s257_s1 = inlined_call_operand.hbm [shape: bf16[32,128], index: 1, kind: input, shape index: {}]   ;;  %s258_s2 = inlined_call_operand.vmem [shape: f32[1,128], index: 2, kind: input, shape index: {}]   ;;  %s259_s3 = inlined_call_operand.hbm [shape: f32[8,128], index: 3, kind: output, shape index: {}]  }
   0x1   :  { %9 = vsyncpa [#allocation6], 0 }
   0x2   :  { %10 = vsyncpa [#allocation4], 0  ;;  %s217_s12 = smov [#allocation2]   ;;  %s218_s14 = smov [#allocation5]  }
   0x3   :  { %s17_s13 = sshll.u32 %s217_s12, 4  ;;  %s26_s15 = sshll.u32 %s218_s14, 4  ;;  %s18_s13 = int_to_ptr.vmem [resolvable:$true] %s17_s13  ;;  %s27_s15 = int_to_ptr.vmem [resolvable:$true] %s26_s15 }
   0x4   :  { %s159_s16 = scalar_lea.vmem %s18_s13, 64  ;;  %p164_p1 = scmp.lt.s32.totalorder %s18_s13, %s18_s13 }
   0x5   :  { %p160_p0 = scmp.ne.s32.totalorder %s18_s13, %s159_s16  ;;  %p165_p2 = scmp.lt.s32.totalorder %s159_s16, %s159_s16 }
   0x7   :  { %p166_p3 = por %p165_p2, %p164_p1 }
   0x9   :  { %p167_p4 = pnand %p166_p3, %p160_p0 }
   0xb   :  { %170 = shalt.err (!%p167_p4)
}
   0xc   :  { %20 = dma.hbm_to_vmem [thread:$0]  %s256_s0, 64, %s18_s13, [#allocation3]  }
   0xd   :  { %s179_s19 = scalar_lea.vmem %s27_s15, 256  ;;  %p184_p6 = scmp.lt.s32.totalorder %s27_s15, %s27_s15 }
   0xe   :  { %p180_p5 = scmp.ne.s32.totalorder %s27_s15, %s179_s19  ;;  %p185_p7 = scmp.lt.s32.totalorder %s179_s19, %s179_s19 }
  0x10   :  { %p186_p8 = por %p185_p7, %p184_p6 }
  0x12   :  { %p187_p9 = pnand %p186_p8, %p180_p5 }
  0x14   :  { %190 = shalt.err (!%p187_p9)
}
  0x15   :  { %s219_s20 = smov 64   ;;  %s220_s21 = smov 4  }
  0x16   :  { %32 = dma.hbm_to_vmem [thread:$0]  %s257_s1, 256, %s27_s15, [#allocation6], %s219_s20, %s219_s20, %s220_s21  }
  0x17   :  { %211 = dma.done.wait [#allocation3], 64  }
  0x18   :  { %212 = vsyncadd [#allocation3], 4294967232 }
  0x19   :  { %213 = dma.done.wait [#allocation6], 256  }
  0x1a   :  { %214 = vsyncadd [#allocation6], 4294967040  ;;  %v221_v0 = vmov 0.0   ;;  %vm222_vm0 = vmmov 0   ;;  %v149_v1 = vld [vmem:[#allocation5 + $0x8] sm:$0xff]   ;;  %v150_v2 = vld [vmem:[#allocation5] sm:$0xff]  }
  0x1b   :  { %134 = vmatprep.subr.bf16.mxu0 %v221_v0  ;;  %138 = vmatprep.mubr.msk.bf16.mxu0 %vm222_vm0, %v221_v0  ;;  %v42_v3 = vld [vmem:[#allocation2] sm:$0xf]  ;;  %vm66_vm1 = vcmask 261120   ;;  %s223_s1 = smov [#allocation7]  }
  0x1c   :  { %135 = vmatpush3.bf16.msra.mxu0 %v149_v1  ;;  %v127_v4 = vld [vmem:[%s258_s2] ss:$0 sm:$0xff]  ;;  %s117_s25 = sshll.u32 %s223_s1, 4  ;;  %s118_s25 = int_to_ptr.vmem [resolvable:$true] %s117_s25 }
  0x1d   :  { %136 = vmatprep.subr.bf16.mxu0 %v221_v0  ;;  %s191_s26 = scalar_lea.vmem %s118_s25, 128  ;;  %p196_p11 = scmp.lt.s32.totalorder %s118_s25, %s118_s25 }
  0x1e   :  { %p192_p10 = scmp.ne.s32.totalorder %s118_s25, %s191_s26  ;;  %p197_p12 = scmp.lt.s32.totalorder %s191_s26, %s191_s26 }
  0x20   :  { %137 = vmatpush3.bf16.msra.mxu0 %v150_v2  ;;  %p198_p13 = por %p197_p12, %p196_p11 }
  0x22   :  { %p199_p0 = pnand %p198_p13, %p192_p10 }
  0x23   :  { %139 = vmatmul.mubr.msk.bf16.vlgmr.msra.gmra.mxu0 %vm66_vm1, %v42_v3 }
  0xe3   :  { %v104_v5 = vpop.f32.mrf.mxu0 }
  0xe4   :  { %v105_v6 = vadd.f32 %v127_v4, %v104_v5 }
  0xe5   :  { %v140_v7 = vpop.f32.mrf.mxu0 }
  0xe6   :  { %110 = vst [vmem:[#allocation7] sm:$0xff] %v105_v6 }
  0xe7   :  { %v107_v8 = vpop.f32.mrf.mxu0 }
  0xe8   :  { %202 = shalt.err (!%p199_p0)
}
  0xe9   :  { %120 = dma.vmem_to_hbm [thread:$0]  %s118_s25, 128, %s259_s3, [#allocation4]   ;;  %v141_v9 = vpop.f32.mrf.mxu0 }
  0xea   :  { %215 = dma.done.wait [#allocation4], 128  }
  0xeb   :  { %216 = vsyncadd [#allocation4], 4294967168 }
  0xec   :  { %124 = vsyncpa [#allocation3], 1 }
  0xed   :  { %125 = vsyncpa [#allocation6], 1 }
  0xee   :  { %126 = vsyncpa [#allocation4], 1 }

</bundles_post_ra>
